<compile_context>
chip_gen: v5e
topology: v5e:2x2
jax: 0.10.0
libtpu: 0.0.40
codegen_flags: <defaults>
</compile_context>

<pallas_src>
import functools
import math
from typing import Dict

import jax
import jax.numpy as jnp
from jax.experimental import pallas as pl
from jax.experimental.pallas import tpu as pltpu


# ----------------------------- Pallas kernel ------------------------------ #
def _conv3x3_relu_kernel(x_ref, w_ref, b_ref, o_ref, *,
                         stride, cin, th, wo, n_row_tiles):
    """One (batch, row-tile) grid step of a fused 3x3 conv + bias + ReLU.

    x_ref: (3*s*Cin, Hs*Wo) bf16  column-gathered, row-parity-split input;
                                  rows ordered (rp, j, cin), flat spatial (rr, c)
    w_ref: (Cout, 9*Cin)    bf16  columns ordered (d)(rp, j, cin)
    b_ref: (Cout, 1)        f32
    o_ref: (Cout, th*Wo)          output rows [t*th, (t+1)*th) flattened (lane-dense)
    """
    s = stride
    ndj = (3 + s - 1) // s                      # number of row offsets d = i // s
    n = th * wo

    if n_row_tiles == 1:
        row0 = 0                                # fully static slicing
    else:
        row0 = pl.multiple_of(pl.program_id(1) * th, th)

    cout = o_ref.shape[0]
    acc = jnp.zeros((cout, n), jnp.float32)
    k0 = 0
    for d in range(ndj):                        # 2 (stride 2) or 3 (stride 1) dots
        nrp = min(s, 3 - s * d)                 # row parities rp with tap i = s*d+rp <= 2
        rows = nrp * 3 * cin
        # contiguous slice: all taps with row offset d, for th output rows.
        xs = x_ref[0:rows, pl.ds((row0 + d) * wo, n)]        # (rows, th*Wo) bf16
        acc = acc + jnp.dot(w_ref[:, k0:k0 + rows], xs,
                            preferred_element_type=jnp.float32)
        k0 += rows
    # bias + ReLU once per tile (not per row), then store lane-dense.
    o_ref[...] = jnp.maximum(acc + b_ref[...], 0.0).astype(o_ref.dtype)


def _pick_row_tile(ho, wo, cout, fixed_bytes, out_itemsize,
                   budget_bytes=24 << 20):
    """Largest divisor `th` of `ho` whose flattened output width th*Wo is a
    multiple of 128 (or the full extent) and whose blocks fit the VMEM budget
    together with the resident per-batch input / weights."""
    cands = [d for d in range(1, ho + 1)
             if ho % d == 0 and (d == ho or (d * wo) % 128 == 0)]
    for th in sorted(cands, reverse=True):
        blk = cout * th * wo * (2 * out_itemsize + 4)   # 2 out bufs + f32 acc
        if fixed_bytes + blk <= budget_bytes:
            return th
    return min(cands)


@functools.partial(jax.jit, static_argnames=("stride", "out_f32"))
def conv3x3_relu_pallas(x_nchw, w_oihw, bias, *, stride, out_f32=True):
    """3x3 conv (padding=1, given stride) + bias + ReLU.  NCHW in -> NCHW out."""
    B, Cin, H, W = x_nchw.shape
    Cout = w_oihw.shape[0]
    s = stride
    Ho = (H - 1) // s + 1
    Wo = (W - 1) // s + 1
    ndj = (3 + s - 1) // s

    # Spatial pad (+1 halo each side), rounded up so Hp/Wp are multiples of s.
    Hp = -(-(H + 2) // s) * s
    Wp = -(-(W + 2) // s) * s
    Hs = Hp // s
    xpad = jnp.pad(x_nchw.astype(jnp.float32),
                   ((0, 0), (0, 0), (1, Hp - H - 1), (1, Wp - W - 1)))

    # Column-gathered, row-parity-split layout (volume ~ 3/s of the input):
    #   planes[b, (rp*3 + j)*Cin + cin, rr*Wo + c] = xpad[b, cin, s*rr + rp, s*c + j]
    xr = xpad.reshape(B, Cin, Hs, s, Wp)
    cols = [xr[..., j: j + s * (Wo - 1) + 1: s] for j in range(3)]  # (B,Cin,Hs,s,Wo)
    xg = jnp.stack(cols, axis=0)                       # (3, B, Cin, Hs, s, Wo)
    xg = jnp.transpose(xg, (1, 4, 0, 2, 3, 5))         # (B, s, 3, Cin, Hs, Wo)
    planes = xg.reshape(B, s * 3 * Cin, Hs * Wo).astype(jnp.bfloat16)

    # Weight columns ordered (d)(rp, j, cin) to match the kernel's K blocks.
    wcols = []
    for d in range(ndj):
        for rp in range(min(s, 3 - s * d)):
            for j in range(3):
                wcols.append(w_oihw[:, :, s * d + rp, j])            # (Cout, Cin)
    wmat = jnp.concatenate(wcols, axis=1).astype(jnp.bfloat16)       # (Cout, 9*Cin)
    b2 = bias.reshape(Cout, 1).astype(jnp.float32)

    out_dtype = jnp.float32 if out_f32 else jnp.bfloat16
    in_rows = s * 3 * Cin
    fixed = 2 * in_rows * Hs * Wo * 2 + Cout * 9 * Cin * 2 + Cout * 4
    th = _pick_row_tile(Ho, Wo, Cout, fixed, jnp.dtype(out_dtype).itemsize)
    n_row_tiles = Ho // th
    grid = (B, n_row_tiles)

    kernel = functools.partial(_conv3x3_relu_kernel, stride=s, cin=Cin,
                               th=th, wo=Wo, n_row_tiles=n_row_tiles)
    out_flat = pl.pallas_call(
        kernel,
        grid=grid,
        in_specs=[
            # Whole per-batch input block; index independent of the row-tile
            # axis -> fetched once per batch, not once per tile.
            pl.BlockSpec((None, in_rows, Hs * Wo), lambda b, t: (b, 0, 0)),
            pl.BlockSpec((Cout, 9 * Cin), lambda b, t: (0, 0)),
            pl.BlockSpec((Cout, 1), lambda b, t: (0, 0)),
        ],
        out_specs=pl.BlockSpec((None, Cout, th * Wo), lambda b, t: (b, 0, t)),
        out_shape=jax.ShapeDtypeStruct((B, Cout, Ho * Wo), out_dtype),
        compiler_params=pltpu.CompilerParams(
            dimension_semantics=("parallel", "parallel"),
            vmem_limit_bytes=48 * 1024 * 1024),
    )(planes, wmat, b2)
    return out_flat.reshape(B, Cout, Ho, Wo)


# ------------------------- pure-XLA reference (check) ---------------------- #
def _conv_reference(x, w, b, stride):
    """f32 conv on bf16-rounded operands (mirrors the kernel's MXU precision)."""
    xq = x.astype(jnp.bfloat16).astype(jnp.float32)
    wq = w.astype(jnp.bfloat16).astype(jnp.float32)
    y = jax.lax.conv_general_dilated(
        xq, wq, window_strides=(stride, stride), padding=((1, 1), (1, 1)),
        dimension_numbers=("NCHW", "OIHW", "NCHW"),
        precision=jax.lax.Precision.HIGHEST)
    return jnp.maximum(y + b.reshape(1, -1, 1, 1), 0.0)


# --------------------------- backbone definition --------------------------- #
def _init_conv_params(key, cin, cout, k=3):
    """Deterministic PyTorch-default-style uniform init."""
    kw_, kb_ = jax.random.split(key)
    fan_in = cin * k * k
    bound = 1.0 / math.sqrt(fan_in)
    w = jax.random.uniform(kw_, (cout, cin, k, k), jnp.float32, -bound, bound)
    b = jax.random.uniform(kb_, (cout,), jnp.float32, -bound, bound)
    return w, b


class BackboneBase:
    """JAX/Pallas analog of the PyTorch BackboneBase module."""

    def __init__(self, key, train_backbone: bool, num_channels: int,
                 return_layers: Dict[str, str]):
        # Small synthetic "backbone": (name, cin, cout, stride)
        specs = [
            ("layer1", 3, 8, 1),
            ("layer2", 8, 16, 2),
            ("layer3", 16, 32, 2),
            ("layer4", 32, 64, 2),
        ]
        keys = jax.random.split(key, len(specs))
        self.layers = []
        for k_, (name, cin, cout, stride) in zip(keys, specs):
            w, b = _init_conv_params(k_, cin, cout)
            self.layers.append((name, w, b, stride))
        self.return_layers = dict(return_layers)
        self.num_channels = num_channels
        # TODO(synk): train_backbone / requires_grad_ freezing is a
        # training-time concern with no forward-pass semantics; not modeled.

    def forward(self, x_nchw):
        # IntermediateLayerGetter semantics: run modules in order, record the
        # requested layers under their new names, stop after the last one.
        out: Dict[str, jnp.ndarray] = {}
        remaining = dict(self.return_layers)
        x = x_nchw
        for name, w, b, stride in self.layers:
            returned = name in remaining
            # Intermediate-only activations are written back in bf16 (the next
            # layer re-quantizes to bf16 anyway); returned features stay f32.
            x = conv3x3_relu_pallas(x, w, b, stride=stride, out_f32=returned)
            if returned:
                out[remaining.pop(name)] = x
            if not remaining:
                break
        return out

    __call__ = forward

    def reference_forward(self, x_nchw):
        """Pure-XLA reference chain with the same bf16 operand rounding."""
        out: Dict[str, jnp.ndarray] = {}
        remaining = dict(self.return_layers)
        x = x_nchw
        for name, w, b, stride in self.layers:
            x = _conv_reference(x, w, b, stride)
            if name in remaining:
                out[remaining.pop(name)] = x
            else:
                # mirror the kernel's bf16 writeback of intermediate layers
                x = x.astype(jnp.bfloat16).astype(jnp.float32)
            if not remaining:
                break
        return out


# ---------------------------------- main ----------------------------------- #
if __name__ == "__main__":
    key = jax.random.PRNGKey(0)
    k_params, k_input = jax.random.split(key)

    return_layers = {"layer2": "0", "layer3": "1", "layer4": "2"}
    model = BackboneBase(k_params, train_backbone=True, num_channels=64,
                         return_layers=return_layers)

    # PyTorch-style NCHW input: batch=2, channels=3, spatial=16x16
    x = jax.random.normal(k_input, (2, 3, 16, 16), dtype=jnp.float32)

    out = model(x)
    for feat in out.values():
        jax.block_until_ready(feat)

    # shape / dtype sanity (layer2/3/4 strides: /2, /4, /8)
    assert out["0"].shape == (2, 16, 8, 8)
    assert out["1"].shape == (2, 32, 4, 4)
    assert out["2"].shape == (2, 64, 2, 2)
    assert all(v.dtype == jnp.float32 for v in out.values())
    assert all(bool(jnp.isfinite(v).all()) for v in out.values())

    # numerical check vs an XLA conv reference with matching bf16 rounding
    ref = model.reference_forward(x)
    for name in out:
        err = float(jnp.max(jnp.abs(out[name] - ref[name])))
        assert err < 2e-2, (name, err)

    print("KERNEL_OK")
</pallas_src>

<mosaic_0001>
module attributes {stable_mosaic.version = 11 : i64} {
  func.func @_conv3x3_relu_kernel(%arg0: i32, %arg1: i32, %arg2: memref<1x9x288xbf16, #tpu.memory_space<vmem>>, %arg3: memref<8x27xbf16, #tpu.memory_space<vmem>>, %arg4: memref<8x1xf32, #tpu.memory_space<vmem>>, %arg5: memref<1x8x256xbf16, #tpu.memory_space<vmem>>) attributes {dimension_semantics = [#tpu.dimension_semantics<parallel>, #tpu.dimension_semantics<parallel>], iteration_bounds = array<i64: 2, 1>, scalar_prefetch = 0 : i64, scratch_operands = 0 : i64, tpu.core_type = #tpu.core_type<tc>, window_params = [{transform_indices = @transform_0, window_bounds = array<i64: 1, 9, 288>}, {pipeline_mode = #tpu.pipeline_mode<synchronous>, transform_indices = @transform_1, window_bounds = array<i64: 8, 27>}, {pipeline_mode = #tpu.pipeline_mode<synchronous>, transform_indices = @transform_2, window_bounds = array<i64: 8, 1>}, {transform_indices = @transform_3, window_bounds = array<i64: 1, 8, 256>}]} {
    %cst = arith.constant 0.000000e+00 : f32
    %0 = vector.broadcast %cst : f32 to vector<8x256xf32>
    %c0 = arith.constant 0 : index
    %c0_0 = arith.constant 0 : index
    %c0_1 = arith.constant 0 : index
    %1 = vector.load %arg2[%c0, %c0_0, %c0_1] : memref<1x9x288xbf16, #tpu.memory_space<vmem>>, vector<1x9x256xbf16>
    %2 = vector.shape_cast %1 : vector<1x9x256xbf16> to vector<9x256xbf16>
    %c0_2 = arith.constant 0 : index
    %c0_3 = arith.constant 0 : index
    %3 = vector.load %arg3[%c0_2, %c0_3] : memref<8x27xbf16, #tpu.memory_space<vmem>>, vector<8x9xbf16>
    %cst_4 = arith.constant dense<0.000000e+00> : vector<8x256xf32>
    %4 = tpu.matmul %3, %2, %cst_4 {dimension_numbers = #tpu.dot_dimension_numbers<[1], [0], [0], [1], [0, 0, 1, 1], [], []>} : vector<8x9xbf16>, vector<9x256xbf16>, vector<8x256xf32> -> vector<8x256xf32>
    %5 = arith.addf %0, %4 : vector<8x256xf32>
    %c0_5 = arith.constant 0 : index
    %c0_6 = arith.constant 0 : index
    %c16 = arith.constant 16 : index
    %6 = vector.load %arg2[%c0_5, %c0_6, %c16] : memref<1x9x288xbf16, #tpu.memory_space<vmem>>, vector<1x9x256xbf16>
    %7 = vector.shape_cast %6 : vector<1x9x256xbf16> to vector<9x256xbf16>
    %c0_7 = arith.constant 0 : index
    %c9 = arith.constant 9 : index
    %8 = vector.load %arg3[%c0_7, %c9] : memref<8x27xbf16, #tpu.memory_space<vmem>>, vector<8x9xbf16>
    %cst_8 = arith.constant dense<0.000000e+00> : vector<8x256xf32>
    %9 = tpu.matmul %8, %7, %cst_8 {dimension_numbers = #tpu.dot_dimension_numbers<[1], [0], [0], [1], [0, 0, 1, 1], [], []>} : vector<8x9xbf16>, vector<9x256xbf16>, vector<8x256xf32> -> vector<8x256xf32>
    %10 = arith.addf %5, %9 : vector<8x256xf32>
    %c0_9 = arith.constant 0 : index
    %c0_10 = arith.constant 0 : index
    %c32 = arith.constant 32 : index
    %11 = vector.load %arg2[%c0_9, %c0_10, %c32] : memref<1x9x288xbf16, #tpu.memory_space<vmem>>, vector<1x9x256xbf16>
    %12 = vector.shape_cast %11 : vector<1x9x256xbf16> to vector<9x256xbf16>
    %c0_11 = arith.constant 0 : index
    %c18 = arith.constant 18 : index
    %13 = vector.load %arg3[%c0_11, %c18] : memref<8x27xbf16, #tpu.memory_space<vmem>>, vector<8x9xbf16>
    %cst_12 = arith.constant dense<0.000000e+00> : vector<8x256xf32>
    %14 = tpu.matmul %13, %12, %cst_12 {dimension_numbers = #tpu.dot_dimension_numbers<[1], [0], [0], [1], [0, 0, 1, 1], [], []>} : vector<8x9xbf16>, vector<9x256xbf16>, vector<8x256xf32> -> vector<8x256xf32>
    %15 = arith.addf %10, %14 : vector<8x256xf32>
    %c0_13 = arith.constant 0 : index
    %c0_14 = arith.constant 0 : index
    %16 = vector.load %arg4[%c0_13, %c0_14] : memref<8x1xf32, #tpu.memory_space<vmem>>, vector<8x1xf32>
    %17 = vector.broadcast %16 : vector<8x1xf32> to vector<8x256xf32>
    %18 = arith.addf %15, %17 : vector<8x256xf32>
    %cst_15 = arith.constant 0.000000e+00 : f32
    %19 = vector.broadcast %cst_15 : f32 to vector<8x256xf32>
    %20 = arith.maximumf %18, %19 : vector<8x256xf32>
    %21 = arith.truncf %20 : vector<8x256xf32> to vector<8x256xbf16>
    %c0_16 = arith.constant 0 : index
    %c0_17 = arith.constant 0 : index
    %c0_18 = arith.constant 0 : index
    %22 = vector.load %arg5[%c0_16, %c0_17, %c0_18] : memref<1x8x256xbf16, #tpu.memory_space<vmem>>, vector<1x8x256xbf16>
    %23 = vector.shape_cast %22 : vector<1x8x256xbf16> to vector<8x256xbf16>
    %24 = vector.shape_cast %21 : vector<8x256xbf16> to vector<1x8x256xbf16>
    tpu.vector_store %arg5[%c0_16, %c0_17, %c0_18], %24 {strides = array<i32>} : memref<1x8x256xbf16, #tpu.memory_space<vmem>>, vector<1x8x256xbf16>,
    return
  }
  func.func @transform_0(%arg0: i32, %arg1: i32) -> (i32, i32, i32) {
    %c0_i32 = arith.constant 0 : i32
    %c0_i32_0 = arith.constant 0 : i32
    %c0_i32_1 = arith.constant 0 : i32
    return %arg0, %c0_i32, %c0_i32_0 : i32, i32, i32
  }
  func.func @transform_1(%arg0: i32, %arg1: i32) -> (i32, i32) {
    %c0_i32 = arith.constant 0 : i32
    %c0_i32_0 = arith.constant 0 : i32
    %c0_i32_1 = arith.constant 0 : i32
    return %c0_i32, %c0_i32_0 : i32, i32
  }
  func.func @transform_2(%arg0: i32, %arg1: i32) -> (i32, i32) {
    %c0_i32 = arith.constant 0 : i32
    %c0_i32_0 = arith.constant 0 : i32
    %c0_i32_1 = arith.constant 0 : i32
    return %c0_i32, %c0_i32_0 : i32, i32
  }
  func.func @transform_3(%arg0: i32, %arg1: i32) -> (i32, i32, i32) {
    %c0_i32 = arith.constant 0 : i32
    %c0_i32_0 = arith.constant 0 : i32
    return %arg0, %c0_i32, %arg1 : i32, i32, i32
  }
}

</mosaic_0001>

<bundles_post_ra>
// kernel: conv3x3_relu_pallas.1
= control target key start
LH: loop header
LB: loop body
LE: loop exit
PB: predicated region body
PF: predicated region fallthrough
CT: control target
= control target key end

     0   :  { %s558_s12 = smov 0   ;;  %s560_s13 = smov 0   ;;  %s609_s0 = inlined_call_operand.vmem [shape: bf16[2,9,288], index: 0, kind: input, shape index: {}]   ;;  %s610_s1 = inlined_call_operand.vmem [shape: bf16[8,27], index: 1, kind: input, shape index: {}]   ;;  %s611_s2 = inlined_call_operand.vmem [shape: f32[8,1], index: 2, kind: input, shape index: {}]   ;;  %s612_s3 = inlined_call_operand.vmem [shape: bf16[2,8,256], index: 3, kind: output, shape index: {}]  }
   0x1   :  { %s562_s14 = smov 0  }
   0x2 LB: > { %s25_s15 = sadd.s32 1, %s526_s13  ;;  %p447_p0 = scmp.ge.s32.totalorder %s530_s14, 1  ;;  %s530_s14 = sphi %s562_s14, %s13_s14   ;;  %s526_s13 = sphi %s560_s13, %s614_s13   ;;  %s522_s12 = sphi %s558_s12, %s613_s12  }
   0x3   : > { %p27_p1 = scmp.ge.s32.totalorder %s25_s15, 2  ;;  %p151_p2 = scmp.lt.s32.totalorder %s530_s14, 3 }
   0x5   : > { %s616_s15 = smov (%p27_p1, %s25_s15), 0  ;;  %p152_p3 = pnand %p447_p0, %p151_p2 }
   0x6   : > { %p179_p4 = scmp.lt.s32.totalorder (!%p152_p3), %s522_s12, 1  ;;  %s532_s22 = smov (!%p152_p3), 112  }
   0x7   : > { %155 = sbr.rel (%p152_p3) target bundleno = 299 (0x12b), region = 32  ;;  %s533_s23 = smov (!%p152_p3), 96  }
   0x8   : > { %s534_s24 = smov (!%p152_p3), 119   ;;  %s535_s25 = smov (!%p152_p3), 110  }
   0xc   : > { %s618_s12 = smov (!%p179_p4, %s522_s12), 1  ;;  %v197_v5 = vld [vmem:[%s610_s1] sm:$0xf]  ;;  %vm231_vm0 = vcmask 1043456   ;;  %vm232_vm1 = vcmask 1044480   ;;  %v536_v12 = vmov 65535  }
   0xd   : > { %s475_s16 = smul.u32 24, %s618_s12  ;;  %v201_v9 = vunpack.c.l.b16 %v197_v5  ;;  %v233_v13 = vsel %vm231_vm0, 4294967295, %v536_v12  ;;  %vm227_vm2 = vcmask 72704   ;;  %v350_v18 = vld [vmem:[%s611_s2] sm:$0xff]  ;;  %v537_v20 = vmov 0   ;;  %s471_s28 = sshll.u32 %s618_s12, 3 }
   0xe   : > { %v234_v14 = vsel %vm232_vm1, %v233_v13, 0  ;;  %506 = vset.pattern.permute.xlu2 %v537_v20  ;;  %507 = vset.pattern.permute.xlu0 %v537_v20  ;;  %vm310_vm3 = vcmask 785408   ;;  %vm224_vm4 = vcmask 916480   ;;  %s192_s4 = scalar_lea.vmem %s612_s3, %s471_s28 }
   0xf   : > { %s183_s19 = scalar_lea.vmem %s609_s0, %s475_s16  ;;  %v202_v11 = vpack.c.b16 %v201_v9, %v201_v9 }
  0x10   : > { %v453_v0 = vld [vmem:[%s183_s19] sm:$0xf]  ;;  %v473_v1 = vld [vmem:[%s183_s19 + $0x8] sm:$0x10]  ;;  %v461_v2 = vld [vmem:[%s183_s19 + $0x8] sm:$0xf] }
  0x11   : > { %v454_v3 = vor.u32 %v473_v1, %v453_v0  ;;  %v474_v4 = vld [vmem:[%s183_s19 + $0x10] sm:$0x10]  ;;  %v472_v7 = vld [vmem:[%s183_s19 + $0x4] sm:$0xf]  ;;  %v455_v8 = vld [vmem:[%s183_s19 + $0xc] sm:$0x10] }
  0x12   : > { %v462_v6 = vor.u32 %v474_v4, %v461_v2  ;;  %v458_v10 = vor.u32 %v472_v7, %v455_v8 }
  0x13   : > { %218 = vrot.lane.b32.xlu0 %v454_v3, %s532_s22  ;;  %304 = vrot.lane.b32.xlu2 %v454_v3, %s533_s23  ;;  %v271_v15 = vand.u32 %v454_v3, %v234_v14 }
  0x14   : > { %222 = vrot.lane.b32.xlu1 %v462_v6, %s532_s22  ;;  %v274_v16 = vand.u32 %v458_v10, %v234_v14 }
  0x15   : > { %283 = vmatpush.bf16.msra.mxu2 %v271_v15 }
  0x16   : > { %296 = vmatpush.bf16.msra.mxu3 %v274_v16 }
  0x18   : > { %465 = vmatmul.msk.bf16.vlgmr.msra.gmra.mxu2 %vm227_vm2, %v197_v5 }
  0x19   : > { %466 = vmatmul.msk.bf16.vlgmr.msra.gmra.mxu3 %vm227_vm2, %v197_v5 }
  0x1b   : > { %220 = vrot.lane.b32.xlu0 %v458_v10, %s532_s22  ;;  %306 = vrot.lane.b32.xlu2 %v458_v10, %s533_s23 }
  0x1c   : > { %203 = vrot.lane.b32.xlu1 %v202_v11, %s534_s24 }
  0x23   : > { %308 = vrot.lane.b32.xlu0 %v462_v6, %s533_s23  ;;  %353 = vperm.xlu2 %506, %v350_v18  }
  0x24   : > { %302 = vrot.lane.b32.xlu1 %v202_v11, %s535_s25 }
  0x6d   : > { %v305_v17 = vpop.permute.xlu2 %304 }
  0x75   : > { %v307_v22 = vpop.permute.xlu2 %306 }
  0x76   : > { %v311_v23 = vsel %vm310_vm3, %v305_v17, %v307_v22 }
  0x77   : > { %v317_v27 = vand.u32 %v311_v23, %v234_v14 }
  0x7d   : > { %v354_v45 = vpop.permute.xlu2 %353 }
  0x85   : > { %v219_v19 = vpop.permute.xlu0 %218 }
  0x86   : > { %v223_v21 = vpop.permute.xlu1 %222 }
  0x8d   : > { %v221_v24 = vpop.permute.xlu0 %220 }
  0x8e   : > { %v225_v25 = vsel %vm224_vm4, %v219_v19, %v221_v24  ;;  %v226_v26 = vsel %vm224_vm4, %v221_v24, %v223_v21  ;;  %v204_v30 = vpop.permute.xlu1 %203 }
  0x8f   : > { %v236_v28 = vand.u32 %v234_v14, %v225_v25  ;;  %v239_v29 = vand.u32 %v234_v14, %v226_v26 }
  0x91   : > { %248 = vmatpush.bf16.msra.mxu0 %v236_v28  ;;  %261 = vmatpush.bf16.msra.mxu1 %v239_v29 }
  0x94   : > { %463 = vmatmul.msk.bf16.vlgmr.msra.gmra.mxu0 %vm227_vm2, %v204_v30  ;;  %464 = vmatmul.msk.bf16.vlgmr.msra.gmra.mxu1 %vm227_vm2, %v204_v30 }
  0x95   : > { %329 = vmatpush.bf16.msrb.mxu0 %v317_v27  ;;  %v309_v31 = vpop.permute.xlu0 %308 }
  0x96   : > { %v312_v32 = vsel %vm310_vm3, %v307_v22, %v309_v31  ;;  %v303_v34 = vpop.permute.xlu1 %302 }
  0x97   : > { %v320_v33 = vand.u32 %v312_v32, %v234_v14 }
  0x99   : > { %342 = vmatpush.bf16.msrb.mxu1 %v320_v33 }
  0x9b   : > { %v285_v35 = vpop.f32.mrf.mxu2 }
  0x9c   : > { %v298_v36 = vpop.f32.mrf.mxu3 }
  0xa3   : > { %v287_v37 = vpop.f32.mrf.mxu2 }
  0xa4   : > { %467 = vmatmul.msk.bf16.vlgmr.msrb.gmra.mxu0 %vm227_vm2, %v303_v34  ;;  %468 = vmatmul.msk.bf16.vlgmr.msrb.gmra.mxu1 %vm227_vm2, %v303_v34  ;;  %v300_v38 = vpop.f32.mrf.mxu3 }
 0x111   : > { %v250_v39 = vpop.f32.mrf.mxu0  ;;  %v263_v40 = vpop.f32.mrf.mxu1 }
 0x112   : > { %v286_v43 = vadd.f32 %v285_v35, %v250_v39  ;;  %v299_v44 = vadd.f32 %v298_v36, %v263_v40 }
 0x119   : > { %v252_v41 = vpop.f32.mrf.mxu0  ;;  %v265_v42 = vpop.f32.mrf.mxu1 }
 0x121   : > { %v331_v46 = vpop.f32.mrf.mxu0  ;;  %v344_v47 = vpop.f32.mrf.mxu1 }
 0x122   : > { %v348_v48 = vadd.f32 %v331_v46, %v286_v43  ;;  %v349_v49 = vadd.f32 %v344_v47, %v299_v44 }
 0x124   : > { %v356_v50 = vadd.f32 %v354_v45, %v348_v48  ;;  %v357_v51 = vadd.f32 %v354_v45, %v349_v49 }
 0x126   : > { %v358_v52 = vmax.f32 %v356_v50, 0.0  ;;  %v359_v53 = vmax.f32 %v357_v51, 0.0 }
 0x128   : > { %v360_v54 = vpack.c.bf16 %v359_v53, %v358_v52 }
 0x129   : > { %v333_v55 = vpop.f32.mrf.mxu0  ;;  %v346_v56 = vpop.f32.mrf.mxu1 }
 0x12a   : > { %361 = vst [vmem:[%s192_s4] sm:$0xff] %v360_v54 }
 0x12b PF: > { %s13_s14 = sadd.s32 1, %s530_s14   ;;  %s613_s12 = smov %s526_s13 }
 0x12c   : > { %p10_p5 = scmp.ge.s32.totalorder %s13_s14, 4   ;;  %s614_s13 = smov %s616_s15 }
 0x12e   :  { %12 = sbr.rel (!%p10_p5) target bundleno = 2 (0x2), region = 62 }

</bundles_post_ra>
